<compile_context>
chip_gen: v7x
topology: tpu7x:2x2x1
jax: 0.10.0
libtpu: 0.0.40
codegen_flags: <defaults>
</compile_context>

<pallas_src>
import functools
import math

import jax
import jax.numpy as jnp
import numpy as np
from jax import lax
from jax.experimental import pallas as pl
from jax.experimental.pallas import tpu as pltpu


def _round_up(a, b):
    return -(-a // b) * b


def _pair(v):
    if isinstance(v, (tuple, list)):
        assert len(v) == 2
        return int(v[0]), int(v[1])
    return int(v), int(v)


def _padded_bytes(shape, dtype):
    """(sublane, lane)-padded VMEM footprint of one buffer (review: pad to (8,128))."""
    isz = jnp.dtype(dtype).itemsize
    sub = 8 * max(1, 4 // isz)                 # f32 -> 8, bf16 -> 16, int8 -> 32
    if len(shape) >= 2:
        lead = 1
        for d in shape[:-2]:
            lead *= int(d)
        return lead * _round_up(int(shape[-2]), sub) * _round_up(int(shape[-1]), 128) * isz
    n = int(shape[0]) if shape else 1
    return _round_up(max(n, 1) * isz, 512)


def _vmem_capacity_bytes():
    try:
        cap = getattr(pltpu.get_tpu_info(), "vmem_capacity_bytes", None)
        if cap:
            return int(cap)
    except Exception:
        pass
    return 64 * 1024 * 1024                    # conservative default (v7x per-core)


def _affine_conv2d_kernel(x_ref, w_ref, m_ref, o_ref, cols_ref, *,
                          tile_n, cin, lane_len, taps, need_mask):
    """Stride-1 conv on lane-flattened images; one grid step = `tile_n` images.

    x_ref    : (tile_n, Cin, L)        flattened image rows (L multiple of 128)
    w_ref    : (Cout, K*K*Cin)         folded weight, VMEM-resident
    m_ref    : (K*K, L)                per-tap border masks (1.0 / 0.0), resident
    o_ref    : (tile_n, Cout, L)       lane-dense flattened-NCHW output
    cols_ref : (K*K*Cin, tile_n*L)     im2col RHS scratch (matmul RHS)
    taps     : tuple of (d, e, f) per tap: flat lane delta d, e = max(-d, 0),
               f = max(d, 0).  Static Python ints -> all slices below are static.
    """
    L = lane_len
    for idx, (d, e, f) in enumerate(taps):
        width = L - e - f
        r0 = idx * cin
        msk = None
        if need_mask[idx]:
            # (1, width) bool, hoisted out of the per-image loop.
            msk = m_ref[idx:idx + 1, e:e + width] > 0.5
        for n in range(tile_n):
            # Lane-shift via a misaligned *static* ref slice (no roll, no xpad).
            src = x_ref[n, :, f:f + width]                      # (Cin, width)
            if msk is not None:
                src = jnp.where(msk, src, jnp.zeros_like(src))
            base = n * L
            cols_ref[r0:r0 + cin, base + e:base + e + width] = src
            if e:   # out-of-image head region of this tap -> zero contribution
                cols_ref[r0:r0 + cin, base:base + e] = jnp.zeros((cin, e), cols_ref.dtype)
            if f:   # out-of-image / discarded tail region
                cols_ref[r0:r0 + cin, base + L - f:base + L] = jnp.zeros((cin, f), cols_ref.dtype)

    # Single folded-contraction MXU matmul for the whole image tile:
    #   (Cout, K*K*Cin) x (K*K*Cin, tile_n*L) -> (Cout, tile_n*L), f32 accumulation.
    acc = jnp.dot(w_ref[...], cols_ref[...], preferred_element_type=jnp.float32)

    # Lane-dense stores (L is a multiple of 128); slices of `acc` are lane-aligned.
    for n in range(tile_n):
        o_ref[n] = acc[:, n * L:(n + 1) * L].astype(o_ref.dtype)


class AffineConv2d:
    """JAX/Pallas port of convex_adversarial.affine.AffineConv2d (bias=False)."""

    def __init__(self, weight, stride=1, padding=0, compute_dtype=None):
        weight = jnp.asarray(weight)
        assert weight.ndim == 4, "expected OIHW conv weight"
        self.weight = weight
        self.out_channels, self.in_channels, self.Kh, self.Kw = map(int, weight.shape)
        self.stride = _pair(stride)
        self.padding = _pair(padding)
        self.compute_dtype = compute_dtype       # e.g. jnp.bfloat16 for 2x bandwidth
        self.in_features = None
        self.out_features = None
        # (Cout, Cin, Kh, Kw) -> (Cout, Kh, Kw, Cin) -> (Cout, Kh*Kw*Cin); row order
        # matches the (kh, kw, ci) ordering of the in-kernel im2col RHS rows.
        self._w2 = jnp.transpose(weight, (0, 2, 3, 1)).reshape(
            self.out_channels, self.Kh * self.Kw * self.in_channels)

    # ---- convert2to4 (exact integer sqrt, asserts square spatial dims) ----
    def _convert2to4(self, x):
        if x.ndim == 1:
            x = x[None, :]
        m, n = x.shape
        k = math.isqrt(n // self.in_channels)
        assert self.in_channels * k * k == n, "input is not Cin * k * k"
        return x.reshape(m, self.in_channels, k, k)

    def __call__(self, x):
        x = jnp.asarray(x)
        if x.ndim != 4:
            x = self._convert2to4(x)
        N, Cin, H, W = map(int, x.shape)
        assert Cin == self.in_channels
        Kh, Kw, Cout = self.Kh, self.Kw, self.out_channels
        Ph, Pw = self.padding
        Sh, Sw = self.stride

        Hout = (H + 2 * Ph - Kh) // Sh + 1
        Wout = (W + 2 * Pw - Kw) // Sw + 1
        assert Hout > 0 and Wout > 0

        cdtype = jnp.dtype(self.compute_dtype) if self.compute_dtype else x.dtype
        odtype = x.dtype

        same_pad = (2 * Ph == Kh - 1) and (2 * Pw == Kw - 1)
        if same_pad:
            # Fast path: output grid == input grid -> exact-size lanes, border masks.
            Gh, Gw = H, W
            xin = x.reshape(N, Cin, H * W)
            tap_list = [(kh - Ph, kw - Pw) for kh in range(Kh) for kw in range(Kw)]
            need_mask = tuple(not (dh == 0 and dw == 0) for dh, dw in tap_list)
        else:
            # Generic path: zero-pad spatially in the wrapper, compute the full
            # stride-1 grid, discard the invalid tail columns afterwards.
            Gh, Gw = H + 2 * Ph, W + 2 * Pw
            xin = jnp.pad(x, ((0, 0), (0, 0), (Ph, Ph), (Pw, Pw))).reshape(N, Cin, Gh * Gw)
            tap_list = [(kh, kw) for kh in range(Kh) for kw in range(Kw)]
            need_mask = tuple(False for _ in tap_list)

        Lraw = Gh * Gw
        L = _round_up(Lraw, 128)
        if L > Lraw:
            xin = jnp.pad(xin, ((0, 0), (0, 0), (0, L - Lraw)))

        KK = Kh * Kw
        KKC = KK * Cin

        taps = tuple((dh * Gw + dw, max(-(dh * Gw + dw), 0), max(dh * Gw + dw, 0))
                     for dh, dw in tap_list)

        # Per-tap border masks (host constants; resident in VMEM).
        lane = np.arange(L)
        rr, cc = lane // Gw, lane % Gw
        m_np = np.zeros((KK, L), np.float32)
        for idx, (dh, dw) in enumerate(tap_list):
            ok = (rr + dh >= 0) & (rr + dh < Gh) & (cc + dw >= 0) & (cc + dw < Gw)
            m_np[idx] = ok.astype(np.float32)
        masks = jnp.asarray(m_np)

        xin = xin.astype(cdtype)
        w2 = self._w2.astype(cdtype)

        # ---- VMEM accounting with padded sizes; per-generation budget ----
        vmem_cap = _vmem_capacity_bytes()
        budget = min(int(vmem_cap * 0.4), 56 * 2 ** 20)
        vmem_limit = max(32 * 2 ** 20, min(int(vmem_cap * 0.75), 96 * 2 ** 20))

        def vmem_use(t):
            return (2 * _padded_bytes((t, Cin, L), cdtype)          # x block (dbl-buf)
                    + 2 * _padded_bytes((t, Cout, L), odtype)       # out block
                    + 2 * _padded_bytes((Cout, KKC), cdtype)        # resident weight
                    + 2 * _padded_bytes((KK, L), jnp.float32)       # resident masks
                    + _padded_bytes((KKC, t * L), cdtype))          # im2col scratch

        max_tile = 1 if N <= 1 else min(8, -(-N // 2))   # keep >= 2 grid steps (megacore)
        tile_n = 1
        for t in range(1, max_tile + 1):
            if vmem_use(t) <= budget:
                tile_n = t

        steps = -(-N // tile_n)
        Npad = steps * tile_n
        if Npad > N:                                   # no divisibility requirement on N
            xin = jnp.pad(xin, ((0, Npad - N), (0, 0), (0, 0)))

        kernel = functools.partial(
            _affine_conv2d_kernel,
            tile_n=tile_n, cin=Cin, lane_len=L, taps=taps, need_mask=need_mask)

        out3 = pl.pallas_call(
            kernel,
            out_shape=jax.ShapeDtypeStruct((Npad, Cout, L), odtype),
            grid_spec=pltpu.PrefetchScalarGridSpec(
                num_scalar_prefetch=0,
                grid=(steps,),
                in_specs=[
                    pl.BlockSpec((tile_n, Cin, L), lambda i: (i, 0, 0)),
                    pl.BlockSpec((Cout, KKC), lambda i: (0, 0)),     # resident weight
                    pl.BlockSpec((KK, L), lambda i: (0, 0)),         # resident masks
                ],
                out_specs=pl.BlockSpec((tile_n, Cout, L), lambda i: (i, 0, 0)),
                scratch_shapes=[pltpu.VMEM((KKC, tile_n * L), cdtype)],
            ),
            compiler_params=pltpu.CompilerParams(
                dimension_semantics=("parallel",),
                vmem_limit_bytes=int(vmem_limit)),
        )(xin, w2, masks)

        # Epilogue (pure layout plumbing): drop batch padding / lane padding, take the
        # valid stride-S sub-grid, flatten NCHW.  For same padding + stride 1 this is
        # a free reshape.
        full = out3[:N, :, :Lraw].reshape(N, Cout, Gh, Gw)
        h_hi = (Hout - 1) * Sh + 1
        w_hi = (Wout - 1) * Sw + 1
        out = full[:, :, 0:h_hi:Sh, 0:w_hi:Sw].reshape(N, Cout * Hout * Wout)

        # record_size
        self.in_features = Cin * H * W
        self.out_features = out.shape[1]
        return out


if __name__ == "__main__":
    key = jax.random.PRNGKey(0)
    k_w, k_x = jax.random.split(key)

    N, Cin, H, W = 2, 4, 16, 16
    Cout, K, P = 8, 3, 1

    weight = jax.random.normal(k_w, (Cout, Cin, K, K), dtype=jnp.float32) * 0.1
    x = jax.random.normal(k_x, (N, Cin, H, W), dtype=jnp.float32)

    layer = AffineConv2d(weight, stride=1, padding=P)
    out = jax.block_until_ready(layer(x))

    ref = lax.conv_general_dilated(
        x, weight, window_strides=(1, 1), padding=((P, P), (P, P)),
        dimension_numbers=("NCHW", "OIHW", "NCHW")).reshape(N, -1)

    assert out.shape == (N, Cout * H * W), out.shape
    assert jnp.allclose(out, ref, atol=1e-4, rtol=1e-4), "mismatch vs reference"

    # 2D-input path (convert2to4) + recorded sizes.
    out2d = jax.block_until_ready(layer(x.reshape(N, -1)))
    assert jnp.allclose(out2d, ref, atol=1e-4, rtol=1e-4)
    assert layer.in_features == Cin * H * W
    assert layer.out_features == Cout * H * W

    # Generic path: valid conv (P=0) with stride 2 (wrapper pre-pad + subsample).
    w_b = jax.random.normal(jax.random.PRNGKey(1), (8, 3, 3, 3), jnp.float32) * 0.1
    x_b = jax.random.normal(jax.random.PRNGKey(2), (2, 3, 9, 9), jnp.float32)
    layer_b = AffineConv2d(w_b, stride=2, padding=0)
    out_b = jax.block_until_ready(layer_b(x_b))
    ref_b = lax.conv_general_dilated(
        x_b, w_b, window_strides=(2, 2), padding=((0, 0), (0, 0)),
        dimension_numbers=("NCHW", "OIHW", "NCHW")).reshape(2, -1)
    assert out_b.shape == ref_b.shape
    assert jnp.allclose(out_b, ref_b, atol=1e-4, rtol=1e-4)

    # bf16 compute option (half the HBM/VMEM traffic, f32 accumulation).
    layer_bf16 = AffineConv2d(weight, stride=1, padding=P, compute_dtype=jnp.bfloat16)
    out_bf16 = jax.block_until_ready(layer_bf16(x))
    assert jnp.allclose(out_bf16, ref, atol=5e-2, rtol=5e-2)

    print("KERNEL_OK")
</pallas_src>

<mosaic_0001>
module attributes {stable_mosaic.version = 11 : i64} {
  func.func @_affine_conv2d_kernel(%arg0: i32, %arg1: memref<1x4x256xf32, #tpu.memory_space<vmem>>, %arg2: memref<8x36xf32, #tpu.memory_space<vmem>>, %arg3: memref<9x256xf32, #tpu.memory_space<vmem>>, %arg4: memref<1x8x256xf32, #tpu.memory_space<vmem>>, %arg5: memref<36x256xf32, #tpu.memory_space<vmem>>) attributes {dimension_semantics = [#tpu.dimension_semantics<parallel>], iteration_bounds = array<i64: 2>, scalar_prefetch = 0 : i64, scratch_operands = 1 : i64, tpu.core_type = #tpu.core_type<tc>, window_params = [{transform_indices = @transform_0, window_bounds = array<i64: 1, 4, 256>}, {pipeline_mode = #tpu.pipeline_mode<synchronous>, transform_indices = @transform_1, window_bounds = array<i64: 8, 36>}, {pipeline_mode = #tpu.pipeline_mode<synchronous>, transform_indices = @transform_2, window_bounds = array<i64: 9, 256>}, {transform_indices = @transform_3, window_bounds = array<i64: 1, 8, 256>}]} {
    %c0 = arith.constant 0 : index
    %c17 = arith.constant 17 : index
    %0 = vector.load %arg3[%c0, %c17] : memref<9x256xf32, #tpu.memory_space<vmem>>, vector<1x239xf32>
    %cst = arith.constant 5.000000e-01 : f32
    %1 = vector.broadcast %cst : f32 to vector<1x239xf32>
    %2 = arith.cmpf ogt, %0, %1 : vector<1x239xf32>
    %c0_0 = arith.constant 0 : index
    %c0_1 = arith.constant 0 : index
    %c0_2 = arith.constant 0 : index
    %3 = vector.load %arg1[%c0_0, %c0_1, %c0_2] : memref<1x4x256xf32, #tpu.memory_space<vmem>>, vector<1x4x239xf32>
    %4 = vector.shape_cast %3 : vector<1x4x239xf32> to vector<4x239xf32>
    %cst_3 = arith.constant 0.000000e+00 : f32
    %5 = vector.broadcast %cst_3 : f32 to vector<4x239xf32>
    %6 = vector.shape_cast %2 : vector<1x239xi1> to vector<1x239xi1>
    %7 = vector.broadcast %6 : vector<1x239xi1> to vector<4x239xi1>
    %8 = arith.select %7, %4, %5 : vector<4x239xi1>, vector<4x239xf32>
    %c0_4 = arith.constant 0 : index
    %c17_5 = arith.constant 17 : index
    %9 = vector.load %arg5[%c0_4, %c17_5] : memref<36x256xf32, #tpu.memory_space<vmem>>, vector<4x239xf32>
    tpu.vector_store %arg5[%c0_4, %c17_5], %8 {strides = array<i32>} : memref<36x256xf32, #tpu.memory_space<vmem>>, vector<4x239xf32>,
    %cst_6 = arith.constant 0.000000e+00 : f32
    %10 = vector.broadcast %cst_6 : f32 to vector<4x17xf32>
    %c0_7 = arith.constant 0 : index
    %c0_8 = arith.constant 0 : index
    %11 = vector.load %arg5[%c0_7, %c0_8] : memref<36x256xf32, #tpu.memory_space<vmem>>, vector<4x17xf32>
    tpu.vector_store %arg5[%c0_7, %c0_8], %10 {strides = array<i32>} : memref<36x256xf32, #tpu.memory_space<vmem>>, vector<4x17xf32>,
    %c1 = arith.constant 1 : index
    %c16 = arith.constant 16 : index
    %12 = vector.load %arg3[%c1, %c16] : memref<9x256xf32, #tpu.memory_space<vmem>>, vector<1x240xf32>
    %cst_9 = arith.constant 5.000000e-01 : f32
    %13 = vector.broadcast %cst_9 : f32 to vector<1x240xf32>
    %14 = arith.cmpf ogt, %12, %13 : vector<1x240xf32>
    %c0_10 = arith.constant 0 : index
    %c0_11 = arith.constant 0 : index
    %c0_12 = arith.constant 0 : index
    %15 = vector.load %arg1[%c0_10, %c0_11, %c0_12] : memref<1x4x256xf32, #tpu.memory_space<vmem>>, vector<1x4x240xf32>
    %16 = vector.shape_cast %15 : vector<1x4x240xf32> to vector<4x240xf32>
    %cst_13 = arith.constant 0.000000e+00 : f32
    %17 = vector.broadcast %cst_13 : f32 to vector<4x240xf32>
    %18 = vector.shape_cast %14 : vector<1x240xi1> to vector<1x240xi1>
    %19 = vector.broadcast %18 : vector<1x240xi1> to vector<4x240xi1>
    %20 = arith.select %19, %16, %17 : vector<4x240xi1>, vector<4x240xf32>
    %c4 = arith.constant 4 : index
    %c16_14 = arith.constant 16 : index
    %21 = vector.load %arg5[%c4, %c16_14] : memref<36x256xf32, #tpu.memory_space<vmem>>, vector<4x240xf32>
    tpu.vector_store %arg5[%c4, %c16_14], %20 {strides = array<i32>} : memref<36x256xf32, #tpu.memory_space<vmem>>, vector<4x240xf32>,
    %cst_15 = arith.constant 0.000000e+00 : f32
    %22 = vector.broadcast %cst_15 : f32 to vector<4x16xf32>
    %c4_16 = arith.constant 4 : index
    %c0_17 = arith.constant 0 : index
    %23 = vector.load %arg5[%c4_16, %c0_17] : memref<36x256xf32, #tpu.memory_space<vmem>>, vector<4x16xf32>
    tpu.vector_store %arg5[%c4_16, %c0_17], %22 {strides = array<i32>} : memref<36x256xf32, #tpu.memory_space<vmem>>, vector<4x16xf32>,
    %c2 = arith.constant 2 : index
    %c15 = arith.constant 15 : index
    %24 = vector.load %arg3[%c2, %c15] : memref<9x256xf32, #tpu.memory_space<vmem>>, vector<1x241xf32>
    %cst_18 = arith.constant 5.000000e-01 : f32
    %25 = vector.broadcast %cst_18 : f32 to vector<1x241xf32>
    %26 = arith.cmpf ogt, %24, %25 : vector<1x241xf32>
    %c0_19 = arith.constant 0 : index
    %c0_20 = arith.constant 0 : index
    %c0_21 = arith.constant 0 : index
    %27 = vector.load %arg1[%c0_19, %c0_20, %c0_21] : memref<1x4x256xf32, #tpu.memory_space<vmem>>, vector<1x4x241xf32>
    %28 = vector.shape_cast %27 : vector<1x4x241xf32> to vector<4x241xf32>
    %cst_22 = arith.constant 0.000000e+00 : f32
    %29 = vector.broadcast %cst_22 : f32 to vector<4x241xf32>
    %30 = vector.shape_cast %26 : vector<1x241xi1> to vector<1x241xi1>
    %31 = vector.broadcast %30 : vector<1x241xi1> to vector<4x241xi1>
    %32 = arith.select %31, %28, %29 : vector<4x241xi1>, vector<4x241xf32>
    %c8 = arith.constant 8 : index
    %c15_23 = arith.constant 15 : index
    %33 = vector.load %arg5[%c8, %c15_23] : memref<36x256xf32, #tpu.memory_space<vmem>>, vector<4x241xf32>
    tpu.vector_store %arg5[%c8, %c15_23], %32 {strides = array<i32>} : memref<36x256xf32, #tpu.memory_space<vmem>>, vector<4x241xf32>,
    %cst_24 = arith.constant 0.000000e+00 : f32
    %34 = vector.broadcast %cst_24 : f32 to vector<4x15xf32>
    %c8_25 = arith.constant 8 : index
    %c0_26 = arith.constant 0 : index
    %35 = vector.load %arg5[%c8_25, %c0_26] : memref<36x256xf32, #tpu.memory_space<vmem>>, vector<4x15xf32>
    tpu.vector_store %arg5[%c8_25, %c0_26], %34 {strides = array<i32>} : memref<36x256xf32, #tpu.memory_space<vmem>>, vector<4x15xf32>,
    %c3 = arith.constant 3 : index
    %c1_27 = arith.constant 1 : index
    %36 = vector.load %arg3[%c3, %c1_27] : memref<9x256xf32, #tpu.memory_space<vmem>>, vector<1x255xf32>
    %cst_28 = arith.constant 5.000000e-01 : f32
    %37 = vector.broadcast %cst_28 : f32 to vector<1x255xf32>
    %38 = arith.cmpf ogt, %36, %37 : vector<1x255xf32>
    %c0_29 = arith.constant 0 : index
    %c0_30 = arith.constant 0 : index
    %c0_31 = arith.constant 0 : index
    %39 = vector.load %arg1[%c0_29, %c0_30, %c0_31] : memref<1x4x256xf32, #tpu.memory_space<vmem>>, vector<1x4x255xf32>
    %40 = vector.shape_cast %39 : vector<1x4x255xf32> to vector<4x255xf32>
    %cst_32 = arith.constant 0.000000e+00 : f32
    %41 = vector.broadcast %cst_32 : f32 to vector<4x255xf32>
    %42 = vector.shape_cast %38 : vector<1x255xi1> to vector<1x255xi1>
    %43 = vector.broadcast %42 : vector<1x255xi1> to vector<4x255xi1>
    %44 = arith.select %43, %40, %41 : vector<4x255xi1>, vector<4x255xf32>
    %c12 = arith.constant 12 : index
    %c1_33 = arith.constant 1 : index
    %45 = vector.load %arg5[%c12, %c1_33] : memref<36x256xf32, #tpu.memory_space<vmem>>, vector<4x255xf32>
    tpu.vector_store %arg5[%c12, %c1_33], %44 {strides = array<i32>} : memref<36x256xf32, #tpu.memory_space<vmem>>, vector<4x255xf32>,
    %cst_34 = arith.constant 0.000000e+00 : f32
    %46 = vector.broadcast %cst_34 : f32 to vector<4x1xf32>
    %c12_35 = arith.constant 12 : index
    %c0_36 = arith.constant 0 : index
    %47 = vector.load %arg5[%c12_35, %c0_36] : memref<36x256xf32, #tpu.memory_space<vmem>>, vector<4x1xf32>
    tpu.vector_store %arg5[%c12_35, %c0_36], %46 {strides = array<i32>} : memref<36x256xf32, #tpu.memory_space<vmem>>, vector<4x1xf32>,
    %c0_37 = arith.constant 0 : index
    %c0_38 = arith.constant 0 : index
    %c0_39 = arith.constant 0 : index
    %48 = vector.load %arg1[%c0_37, %c0_38, %c0_39] : memref<1x4x256xf32, #tpu.memory_space<vmem>>, vector<1x4x256xf32>
    %49 = vector.shape_cast %48 : vector<1x4x256xf32> to vector<4x256xf32>
    %c16_40 = arith.constant 16 : index
    %c0_41 = arith.constant 0 : index
    %50 = vector.load %arg5[%c16_40, %c0_41] : memref<36x256xf32, #tpu.memory_space<vmem>>, vector<4x256xf32>
    tpu.vector_store %arg5[%c16_40, %c0_41], %49 {strides = array<i32>} : memref<36x256xf32, #tpu.memory_space<vmem>>, vector<4x256xf32>,
    %c5 = arith.constant 5 : index
    %c0_42 = arith.constant 0 : index
    %51 = vector.load %arg3[%c5, %c0_42] : memref<9x256xf32, #tpu.memory_space<vmem>>, vector<1x255xf32>
    %cst_43 = arith.constant 5.000000e-01 : f32
    %52 = vector.broadcast %cst_43 : f32 to vector<1x255xf32>
    %53 = arith.cmpf ogt, %51, %52 : vector<1x255xf32>
    %c0_44 = arith.constant 0 : index
    %c0_45 = arith.constant 0 : index
    %c1_46 = arith.constant 1 : index
    %54 = vector.load %arg1[%c0_44, %c0_45, %c1_46] : memref<1x4x256xf32, #tpu.memory_space<vmem>>, vector<1x4x255xf32>
    %55 = vector.shape_cast %54 : vector<1x4x255xf32> to vector<4x255xf32>
    %cst_47 = arith.constant 0.000000e+00 : f32
    %56 = vector.broadcast %cst_47 : f32 to vector<4x255xf32>
    %57 = vector.shape_cast %53 : vector<1x255xi1> to vector<1x255xi1>
    %58 = vector.broadcast %57 : vector<1x255xi1> to vector<4x255xi1>
    %59 = arith.select %58, %55, %56 : vector<4x255xi1>, vector<4x255xf32>
    %c20 = arith.constant 20 : index
    %c0_48 = arith.constant 0 : index
    %60 = vector.load %arg5[%c20, %c0_48] : memref<36x256xf32, #tpu.memory_space<vmem>>, vector<4x255xf32>
    tpu.vector_store %arg5[%c20, %c0_48], %59 {strides = array<i32>} : memref<36x256xf32, #tpu.memory_space<vmem>>, vector<4x255xf32>,
    %cst_49 = arith.constant 0.000000e+00 : f32
    %61 = vector.broadcast %cst_49 : f32 to vector<4x1xf32>
    %c20_50 = arith.constant 20 : index
    %c255 = arith.constant 255 : index
    %62 = vector.load %arg5[%c20_50, %c255] : memref<36x256xf32, #tpu.memory_space<vmem>>, vector<4x1xf32>
    tpu.vector_store %arg5[%c20_50, %c255], %61 {strides = array<i32>} : memref<36x256xf32, #tpu.memory_space<vmem>>, vector<4x1xf32>,
    %c6 = arith.constant 6 : index
    %c0_51 = arith.constant 0 : index
    %63 = vector.load %arg3[%c6, %c0_51] : memref<9x256xf32, #tpu.memory_space<vmem>>, vector<1x241xf32>
    %cst_52 = arith.constant 5.000000e-01 : f32
    %64 = vector.broadcast %cst_52 : f32 to vector<1x241xf32>
    %65 = arith.cmpf ogt, %63, %64 : vector<1x241xf32>
    %c0_53 = arith.constant 0 : index
    %c0_54 = arith.constant 0 : index
    %c15_55 = arith.constant 15 : index
    %66 = vector.load %arg1[%c0_53, %c0_54, %c15_55] : memref<1x4x256xf32, #tpu.memory_space<vmem>>, vector<1x4x241xf32>
    %67 = vector.shape_cast %66 : vector<1x4x241xf32> to vector<4x241xf32>
    %cst_56 = arith.constant 0.000000e+00 : f32
    %68 = vector.broadcast %cst_56 : f32 to vector<4x241xf32>
    %69 = vector.shape_cast %65 : vector<1x241xi1> to vector<1x241xi1>
    %70 = vector.broadcast %69 : vector<1x241xi1> to vector<4x241xi1>
    %71 = arith.select %70, %67, %68 : vector<4x241xi1>, vector<4x241xf32>
    %c24 = arith.constant 24 : index
    %c0_57 = arith.constant 0 : index
    %72 = vector.load %arg5[%c24, %c0_57] : memref<36x256xf32, #tpu.memory_space<vmem>>, vector<4x241xf32>
    tpu.vector_store %arg5[%c24, %c0_57], %71 {strides = array<i32>} : memref<36x256xf32, #tpu.memory_space<vmem>>, vector<4x241xf32>,
    %cst_58 = arith.constant 0.000000e+00 : f32
    %73 = vector.broadcast %cst_58 : f32 to vector<4x15xf32>
    %c24_59 = arith.constant 24 : index
    %c241 = arith.constant 241 : index
    %74 = vector.load %arg5[%c24_59, %c241] : memref<36x256xf32, #tpu.memory_space<vmem>>, vector<4x15xf32>
    tpu.vector_store %arg5[%c24_59, %c241], %73 {strides = array<i32>} : memref<36x256xf32, #tpu.memory_space<vmem>>, vector<4x15xf32>,
    %c7 = arith.constant 7 : index
    %c0_60 = arith.constant 0 : index
    %75 = vector.load %arg3[%c7, %c0_60] : memref<9x256xf32, #tpu.memory_space<vmem>>, vector<1x240xf32>
    %cst_61 = arith.constant 5.000000e-01 : f32
    %76 = vector.broadcast %cst_61 : f32 to vector<1x240xf32>
    %77 = arith.cmpf ogt, %75, %76 : vector<1x240xf32>
    %c0_62 = arith.constant 0 : index
    %c0_63 = arith.constant 0 : index
    %c16_64 = arith.constant 16 : index
    %78 = vector.load %arg1[%c0_62, %c0_63, %c16_64] : memref<1x4x256xf32, #tpu.memory_space<vmem>>, vector<1x4x240xf32>
    %79 = vector.shape_cast %78 : vector<1x4x240xf32> to vector<4x240xf32>
    %cst_65 = arith.constant 0.000000e+00 : f32
    %80 = vector.broadcast %cst_65 : f32 to vector<4x240xf32>
    %81 = vector.shape_cast %77 : vector<1x240xi1> to vector<1x240xi1>
    %82 = vector.broadcast %81 : vector<1x240xi1> to vector<4x240xi1>
    %83 = arith.select %82, %79, %80 : vector<4x240xi1>, vector<4x240xf32>
    %c28 = arith.constant 28 : index
    %c0_66 = arith.constant 0 : index
    %84 = vector.load %arg5[%c28, %c0_66] : memref<36x256xf32, #tpu.memory_space<vmem>>, vector<4x240xf32>
    tpu.vector_store %arg5[%c28, %c0_66], %83 {strides = array<i32>} : memref<36x256xf32, #tpu.memory_space<vmem>>, vector<4x240xf32>,
    %cst_67 = arith.constant 0.000000e+00 : f32
    %85 = vector.broadcast %cst_67 : f32 to vector<4x16xf32>
    %c28_68 = arith.constant 28 : index
    %c240 = arith.constant 240 : index
    %86 = vector.load %arg5[%c28_68, %c240] : memref<36x256xf32, #tpu.memory_space<vmem>>, vector<4x16xf32>
    tpu.vector_store %arg5[%c28_68, %c240], %85 {strides = array<i32>} : memref<36x256xf32, #tpu.memory_space<vmem>>, vector<4x16xf32>,
    %c8_69 = arith.constant 8 : index
    %c0_70 = arith.constant 0 : index
    %87 = vector.load %arg3[%c8_69, %c0_70] : memref<9x256xf32, #tpu.memory_space<vmem>>, vector<1x239xf32>
    %cst_71 = arith.constant 5.000000e-01 : f32
    %88 = vector.broadcast %cst_71 : f32 to vector<1x239xf32>
    %89 = arith.cmpf ogt, %87, %88 : vector<1x239xf32>
    %c0_72 = arith.constant 0 : index
    %c0_73 = arith.constant 0 : index
    %c17_74 = arith.constant 17 : index
    %90 = vector.load %arg1[%c0_72, %c0_73, %c17_74] : memref<1x4x256xf32, #tpu.memory_space<vmem>>, vector<1x4x239xf32>
    %91 = vector.shape_cast %90 : vector<1x4x239xf32> to vector<4x239xf32>
    %cst_75 = arith.constant 0.000000e+00 : f32
    %92 = vector.broadcast %cst_75 : f32 to vector<4x239xf32>
    %93 = vector.shape_cast %89 : vector<1x239xi1> to vector<1x239xi1>
    %94 = vector.broadcast %93 : vector<1x239xi1> to vector<4x239xi1>
    %95 = arith.select %94, %91, %92 : vector<4x239xi1>, vector<4x239xf32>
    %c32 = arith.constant 32 : index
    %c0_76 = arith.constant 0 : index
    %96 = vector.load %arg5[%c32, %c0_76] : memref<36x256xf32, #tpu.memory_space<vmem>>, vector<4x239xf32>
    tpu.vector_store %arg5[%c32, %c0_76], %95 {strides = array<i32>} : memref<36x256xf32, #tpu.memory_space<vmem>>, vector<4x239xf32>,
    %cst_77 = arith.constant 0.000000e+00 : f32
    %97 = vector.broadcast %cst_77 : f32 to vector<4x17xf32>
    %c32_78 = arith.constant 32 : index
    %c239 = arith.constant 239 : index
    %98 = vector.load %arg5[%c32_78, %c239] : memref<36x256xf32, #tpu.memory_space<vmem>>, vector<4x17xf32>
    tpu.vector_store %arg5[%c32_78, %c239], %97 {strides = array<i32>} : memref<36x256xf32, #tpu.memory_space<vmem>>, vector<4x17xf32>,
    %c0_79 = arith.constant 0 : index
    %c0_80 = arith.constant 0 : index
    %99 = vector.load %arg2[%c0_79, %c0_80] : memref<8x36xf32, #tpu.memory_space<vmem>>, vector<8x36xf32>
    %c0_81 = arith.constant 0 : index
    %c0_82 = arith.constant 0 : index
    %100 = vector.load %arg5[%c0_81, %c0_82] : memref<36x256xf32, #tpu.memory_space<vmem>>, vector<36x256xf32>
    %cst_83 = arith.constant dense<0.000000e+00> : vector<8x256xf32>
    %101 = tpu.matmul %99, %100, %cst_83 {dimension_numbers = #tpu.dot_dimension_numbers<[1], [0], [0], [1], [0, 0, 1, 1], [], []>} : vector<8x36xf32>, vector<36x256xf32>, vector<8x256xf32> -> vector<8x256xf32>
    %c0_84 = arith.constant 0 : index
    %c0_85 = arith.constant 0 : index
    %c0_86 = arith.constant 0 : index
    %102 = vector.load %arg4[%c0_84, %c0_85, %c0_86] : memref<1x8x256xf32, #tpu.memory_space<vmem>>, vector<1x8x256xf32>
    %103 = vector.shape_cast %102 : vector<1x8x256xf32> to vector<8x256xf32>
    %104 = vector.shape_cast %101 : vector<8x256xf32> to vector<1x8x256xf32>
    tpu.vector_store %arg4[%c0_84, %c0_85, %c0_86], %104 {strides = array<i32>} : memref<1x8x256xf32, #tpu.memory_space<vmem>>, vector<1x8x256xf32>,
    return
  }
  func.func @transform_0(%arg0: i32) -> (i32, i32, i32) {
    %c0_i32 = arith.constant 0 : i32
    %c0_i32_0 = arith.constant 0 : i32
    %c0_i32_1 = arith.constant 0 : i32
    return %arg0, %c0_i32, %c0_i32_0 : i32, i32, i32
  }
  func.func @transform_1(%arg0: i32) -> (i32, i32) {
    %c0_i32 = arith.constant 0 : i32
    %c0_i32_0 = arith.constant 0 : i32
    %c0_i32_1 = arith.constant 0 : i32
    return %c0_i32, %c0_i32_0 : i32, i32
  }
  func.func @transform_2(%arg0: i32) -> (i32, i32) {
    %c0_i32 = arith.constant 0 : i32
    %c0_i32_0 = arith.constant 0 : i32
    %c0_i32_1 = arith.constant 0 : i32
    return %c0_i32, %c0_i32_0 : i32, i32
  }
  func.func @transform_3(%arg0: i32) -> (i32, i32, i32) {
    %c0_i32 = arith.constant 0 : i32
    %c0_i32_0 = arith.constant 0 : i32
    %c0_i32_1 = arith.constant 0 : i32
    return %arg0, %c0_i32, %c0_i32_0 : i32, i32, i32
  }
}

</mosaic_0001>

<bundles_post_ra>
// kernel: tpu_custom_call.1
= control target key start
LH: loop header
LB: loop body
LE: loop exit
PB: predicated region body
PF: predicated region fallthrough
CT: control target
= control target key end

     0   :  { %8 = vsyncpa [#allocation4], 0  ;;  %s1356_s0 = inlined_call_operand.hbm [shape: f32[2,4,256], index: 0, kind: input, shape index: {}]   ;;  %s1357_s1 = inlined_call_operand.hbm [shape: f32[8,36], index: 1, kind: input, shape index: {}]   ;;  %s1358_s2 = inlined_call_operand.hbm [shape: f32[9,256], index: 2, kind: input, shape index: {}]   ;;  %s1359_s3 = inlined_call_operand.hbm [shape: f32[2,8,256], index: 3, kind: output, shape index: {}]  }
   0x1   :  { %10 = vsyncpa [#allocation4 + $0x1], 0 }
   0x2   :  { %11 = vsyncpa [#allocation7], 0 }
   0x3   :  { %12 = vsyncpa [#allocation5], 0 }
   0x4   :  { %14 = vsyncpa [#allocation5 + $0x1], 0  ;;  %s1003_s12 = smov 0   ;;  %s1005_s13 = smov 0  }
   0x5   :  { %s1007_s14 = smov 0   ;;  %s1009_s15 = smov 0  }
   0x6 LB: > { %s1024_s16 = sadd.s32 4294967295, %s965_s15   ;;  %s698_s17 = sadd.s32 4294967294, %s965_s15   ;;  %s965_s15 = sphi %s1009_s15, %s1405_s15   ;;  %s961_s14 = sphi %s1007_s14, %s1404_s14   ;;  %s957_s13 = sphi %s1005_s13, %s1403_s13   ;;  %s953_s12 = sphi %s1003_s12, %s1402_s12  }
   0x7   : > { %p40_p0 = scmp.ne.s32.totalorder %s957_s13, %s953_s12  ;;  %p1360_p1 = scmp.eq.s32.totalorder %s1024_s16, 0 }
   0x8   : > { %p112_p3 = scmp.eq.s32.totalorder %s698_s17, 1  ;;  %p699_p5 = scmp.ge.s32.totalorder %s965_s15, 1 }
   0x9   : > { %p1033_p4 = por %p1360_p1, %p40_p0  ;;  %p119_p7 = scmp.lt.s32.totalorder %s965_s15, 3 }
   0xa   : > { %p1038_p6 = por %p112_p3, %p40_p0  ;;  %s967_s21 = smov [#allocation6]  }
   0xb   : > { %s1363_s18 = scalar_select %p1033_p4, 1, 0 }
   0xc   : > { %s1364_s19 = scalar_select %p1038_p6, 1, 0 }
   0xd   : > { %p1043_p8 = pnand %p699_p5, %p119_p7  ;;  %s132_s22 = sshll.u32 %s967_s21, 4  ;;  %s133_s22 = int_to_ptr.vmem [resolvable:$true] %s132_s22 }
   0xe   : > { %s968_s23 = smov [#allocation8]   ;;  %s809_s28 = scalar_lea.hbm %s1357_s1, 128 }
   0xf   : > { %s1365_s20 = scalar_select %p1043_p8, 1, 0 }
  0x10   : > { %p741_p10 = pneg %p1043_p8  ;;  %s142_s24 = sshll.u32 %s968_s23, 4  ;;  %s1056_s24 = int_to_ptr.vmem [resolvable:$true] %s142_s24 }
  0x11   : > { %p810_p12 = scmp.ne.s32.totalorder %s1357_s1, %s809_s28  ;;  %p816_p5 = scmp.lt.u32.totalorder %s809_s28, %s1357_s1 }
  0x12   : > { %p1052_p11 = pnand %p741_p10, %p1360_p1 }
  0x14   : > { %p811_p13 = pneg %p1052_p11 }
  0x16   : > { %p812_p0 = pnand %p811_p13, %p810_p12 }
  0x18   : > { %p813_p3 = pneg %p812_p0 }
  0x1a   : > { %p818_p7 = pnand %p816_p5, %p813_p3 }
  0x1c   : > { %821 = shalt.err (!%p818_p7)
}
  0x1d   : > { %s822_s6 = scalar_lea.vmem %s133_s22, 128  ;;  %p830_p2 = scmp.lt.s32.totalorder %s133_s22, %s133_s22 }
  0x1e   : > { %p823_p10 = scmp.ne.s32.totalorder %s133_s22, %s822_s6  ;;  %p831_p6 = scmp.lt.s32.totalorder %s822_s6, %s822_s6 }
  0x20   : > { %p825_p9 = pnand %p823_p10, %p811_p13  ;;  %p832_p4 = por %p831_p6, %p830_p2 }
  0x22   : > { %p826_p1 = pneg %p825_p9 }
  0x24   : > { %p833_p8 = pnand %p832_p4, %p826_p1 }
  0x26   : > { %836 = shalt.err (!%p833_p8)
}
  0x27   : > { %744 = dma.hbm_to_vmem [thread:$0]  (!%p1052_p11), %s1357_s1, 128, %s133_s22, [#allocation7]  }
  0x28   : > { %s837_s11 = scalar_lea.hbm %s1358_s2, 512 }
  0x29   : > { %p838_p9 = scmp.ne.s32.totalorder %s1358_s2, %s837_s11  ;;  %p844_p4 = scmp.lt.u32.totalorder %s837_s11, %s1358_s2 }
  0x2b   : > { %p840_p2 = pnand %p838_p9, %p811_p13 }
  0x2d   : > { %p841_p1 = pneg %p840_p2 }
  0x2f   : > { %p846_p6 = pnand %p844_p4, %p841_p1 }
  0x31   : > { %849 = shalt.err (!%p846_p6)
}
  0x32   : > { %s850_s22 = scalar_lea.vmem %s1056_s24, 512  ;;  %p858_p3 = scmp.lt.s32.totalorder %s1056_s24, %s1056_s24 }
  0x33   : > { %p851_p8 = scmp.ne.s32.totalorder %s1056_s24, %s850_s22  ;;  %p859_p5 = scmp.lt.s32.totalorder %s850_s22, %s850_s22 }
  0x35   : > { %p853_p12 = pnand %p851_p8, %p811_p13  ;;  %p860_p7 = por %p859_p5, %p858_p3 }
  0x37   : > { %p854_p0 = pneg %p853_p12 }
  0x39   : > { %p861_p10 = pnand %p860_p7, %p854_p0 }
  0x3b   : > { %864 = shalt.err (!%p861_p10)
}
  0x3c   : > { %s969_s27 = smov 256   ;;  %s970_s28 = smov 16  }
  0x3d   : > { %747 = dma.hbm_to_vmem [thread:$0]  (!%p1052_p11), %s1358_s2, 512, %s1056_s24, [#allocation7], %s969_s27, %s969_s27, %s970_s28  }
  0x3e   : > { %s1106_s4 = sadd.s32 1, %s965_s15   ;;  %s27_s5 = sadd.s32 1, %s961_s14 }
  0x3f   : > { %s24_s6 = ssub.s32 %s965_s15, %s1106_s4  ;;  %p34_p13 = scmp.ne.s32.totalorder %s961_s14, %s957_s13 }
  0x40   : > { %p25_p9 = scmp.eq.s32.totalorder %s24_s6, 0  ;;  %p35_p2 = scmp.eq.s32.totalorder %s965_s15, 0 }
  0x41   : > { %p1367_p1 = scmp.eq.s32.totalorder %s1024_s16, 1  ;;  %p758_p6 = scmp.lt.s32.totalorder %s965_s15, 2 }
  0x42   : > { %s1122_s8 = scalar_select %p25_p9, %s961_s14, %s27_s5  }
  0x43   : > { %p1116_p4 = por %p1367_p1, %p34_p13  ;;  %p36_p8 = por %p35_p2, %p34_p13 }
  0x44   : > { %s156_s25 = sand.u32 1, %s961_s14   ;;  %s719_s24 = sshll.u32 %s965_s15, 7 }
  0x45   : > { %s703_s9 = sshll.u32 %s156_s25, 3  ;;  %s1129_s17 = scalar_lea.hbm %s1356_s0, %s719_s24 }
  0x46   : > { %s160_s21 = scalar_lea.vmem [#allocation3], %s703_s9  ;;  %p1133_p11 = pnand %p758_p6, %p36_p8 }
  0x47   : > { %s168_s23 = sshll.u32 %s160_s21, 4  ;;  %s157_s22 = scalar_lea.sflag [#allocation4], %s156_s25  ;;  %s1131_s23 = int_to_ptr.vmem [resolvable:$true] %s168_s23 }
  0x48   : > { %s865_s27 = scalar_lea.hbm %s1129_s17, 128  ;;  %p867_p0 = pneg %p1133_p11 }
  0x49   : > { %p866_p12 = scmp.ne.s32.totalorder %s1129_s17, %s865_s27  ;;  %s870_s30 = scalar_lea.hbm %s1356_s0, 256 }
  0x4a   : > { %p871_p7 = scmp.lt.u32.totalorder %s1129_s17, %s1356_s0  ;;  %p872_p10 = scmp.lt.u32.totalorder %s870_s30, %s865_s27 }
  0x4b   : > { %p868_p3 = pnand %p867_p0, %p866_p12  ;;  %p874_p9 = scmp.lt.u32.totalorder %s865_s27, %s1129_s17 }
  0x4c   : > { %p873_p13 = por %p872_p10, %p871_p7 }
  0x4d   : > { %p869_p5 = pneg %p868_p3 }
  0x4e   : > { %p875_p2 = por %p874_p9, %p873_p13 }
  0x50   : > { %p876_p1 = pnand %p875_p2, %p869_p5 }
  0x52   : > { %879 = shalt.err (!%p876_p1)
}
  0x53   : > { %s880_s25 = scalar_lea.vmem %s1131_s23, 128  ;;  %s971_s9 = smov [#allocation3]  }
  0x54   : > { %p881_p6 = scmp.ne.s32.totalorder %s1131_s23, %s880_s25  ;;  %s885_s24 = sshll.u32 %s971_s9, 4  ;;  %s886_s24 = int_to_ptr.vmem [resolvable:$false] %s885_s24 }
  0x55   : > { %s887_s10 = scalar_lea.vmem %s886_s24, 256  ;;  %p888_p3 = scmp.lt.s32.totalorder %s1131_s23, %s886_s24 }
  0x56   : > { %p883_p8 = pnand %p881_p6, %p867_p0  ;;  %p889_p7 = scmp.lt.s32.totalorder %s887_s10, %s880_s25 }
  0x58   : > { %p884_p12 = pneg %p883_p8  ;;  %p890_p10 = por %p889_p7, %p888_p3 }
  0x5a   : > { %p891_p13 = pnand %p890_p10, %p884_p12 }
  0x5c   : > { %894 = shalt.err (!%p891_p13)
}
  0x5d   : > { %751 = dma.hbm_to_vmem [thread:$0]  (!%p1133_p11), %s1129_s17, 128, %s1131_s23, %s157_s22  }
  0x5e   : > { %p1370_p5 = scmp.ne.s32.totalorder %s1365_s20, 0 }
  0x5f   : > { %s1165_s11 = sand.u32 (!%p1370_p5), 1, %s957_s13   ;;  %p1371_p0 = scmp.ne.s32.totalorder (!%p1370_p5), %s1363_s18, 0 }
  0x60   : > { %177 = sbr.rel (%p1370_p5) target bundleno = 493 (0x1ed), region = 32  ;;  %s707_s21 = sshll.u32 (!%p1370_p5), %s1165_s11, 3 }
  0x61   : > { %s180_s27 = scalar_lea.sflag (!%p1370_p5), [#allocation4], %s1165_s11  ;;  %s183_s28 = scalar_lea.vmem (!%p1370_p5), [#allocation3], %s707_s21 }
  0x67   : > { %940 = dma.done.wait (%p1371_p0), %s180_s27, 128  }
  0x68   : > { %942 = vsyncadd (%p1371_p0), %s180_s27, 4294967168  ;;  %p1372_p9 = scmp.eq.s32.totalorder %s1024_s16, 0 }
  0x6a   : > { %944 = dma.done.wait (%p1372_p9), [#allocation7], 640   ;;  %p1373_p11 = pmov %p1372_p9 }
  0x6b   : > { %v972_v0 = vmov 0.0   ;;  %v318_v1 = vld [vmem:[%s183_s28] sm:$0xff]  ;;  %s973_s20 = smov 1   ;;  %s974_s17 = smov 16   ;;  %v218_v3 = vlaneseq  ;;  %v981_v9 = vmov 0   ;;  %vm348_vm5 = vcmask 1047564  }
  0x6c   : > { %946 = vsyncadd (%p1373_p11), [#allocation7], 4294966656  ;;  %585 = vmatprep.mubr.f32.mxu0 %v972_v0  ;;  %332 = vrot.lane.b32.xlu1 %v318_v1, %s973_s20  ;;  %v331_v2 = vcombine.high %v318_v1, %v318_v1  ;;  %357 = vst [vmem:[#allocation2 + $0x20] sm:$0xf] %v318_v1  ;;  %s975_s18 = smov 17   ;;  %s976_s23 = smov 15  }
  0x6d   : > { %262 = vrot.lane.b32.xlu0 %v318_v1, %s974_s17  ;;  %s977_s26 = smov 127   ;;  %s978_s22 = smov 112   ;;  %v316_v4 = vld [vmem:[#allocation8 + $0x3] ss:$8 sm:$0x3]  ;;  %v219_v6 = vshrl.u32 %v218_v3, 7 }
  0x6e   : > { %358 = vst [vmem:[#allocation2 + $0x28] sm:$0xf] %v331_v2  ;;  %s979_s29 = smov 113   ;;  %s980_s30 = smov 111   ;;  %vm317_vm0 = vcmp.gt.f32.partialorder %v316_v4, 0.5  ;;  %vm351_vm6 = vcmask 7172  }
  0x6f   : > { %v246_v5 = vld [vmem:[#allocation8 + $0x1] ss:$8 sm:$0x3]  ;;  %v214_v7 = vld [vmem:[#allocation8] ss:$8 sm:$0x3] }
  0x70   : > { %334 = vrot.lane.b32.xlu1 %v331_v2, %s973_s20  ;;  %vm247_vm1 = vcmp.gt.f32.partialorder %v246_v5, 0.5  ;;  %v1178_v8 = vsub.s32 0, %v219_v6  ;;  %v319_v10 = vsel %vm317_vm0, 1, %v981_v9  ;;  %vm215_vm2 = vcmp.gt.f32.partialorder %v214_v7, 0.5  ;;  %s710_s5 = sshll.u32 %s1165_s11, 4  ;;  %s720_s9 = sshll.u32 %s1024_s16, 8 }
  0x71   : > { %230 = vrot.lane.b32.xlu0 %v318_v1, %s975_s18  ;;  %v249_v11 = vsel %vm247_vm1, 1, %v981_v9  ;;  %v1184_v14 = vsub.s32 1, %v219_v6  ;;  %v217_v15 = vsel %vm215_vm2, 1, %v981_v9  ;;  %v284_v16 = vld [vmem:[#allocation8 + $0x2] ss:$8 sm:$0x3]  ;;  %s1314_s21 = scalar_lea.hbm %s1359_s3, %s720_s9 }
  0x72   : > { %v323_v12 = vrot.slane %v319_v10, %v1178_v8  ;;  %v253_v13 = vrot.slane %v249_v11, %v1178_v8  ;;  %v221_v19 = vrot.slane %v217_v15, %v1178_v8  ;;  %vm285_vm7 = vcmp.gt.f32.partialorder %v284_v16, 0.5  ;;  %v360_v23 = vld [vmem:[#allocation8 + $0x5] ss:$8 sm:$0x3]  ;;  %s213_s6 = scalar_lea.vmem [#allocation9], %s710_s5  ;;  %s595_s27 = scalar_lea.sflag [#allocation5], %s1165_s11 }
  0x73   : > { %v327_v20 = vrot.slane %v319_v10, %v1184_v14  ;;  %vm278_vm8 = vcmask 1047684   ;;  %vm281_vm9 = vcmask 130052   ;;  %vm336_vm10 = vcmask 7168   ;;  %v430_v28 = vld [vmem:[#allocation8 + $0x7] ss:$8 sm:$0x3] }
  0x74   : > { %232 = vrot.lane.b32.xlu1 %v331_v2, %s975_s18  ;;  %vm1187_vm3 = vcmp.eq.s32.totalorder %v323_v12, 1  ;;  %vm1191_vm4 = vcmp.eq.s32.totalorder %v253_v13, 1  ;;  %v257_v26 = vrot.slane %v249_v11, %v1184_v14  ;;  %v225_v27 = vrot.slane %v217_v15, %v1184_v14  ;;  %v398_v48 = vld [vmem:[#allocation8 + $0x6] ss:$8 sm:$0x3]  ;;  %s609_s25 = sshll.u32 %s213_s6, 4  ;;  %s1309_s25 = int_to_ptr.vmem [resolvable:$true] %s609_s25 }
  0x75   : > { %264 = vrot.lane.b32.xlu0 %v331_v2, %s974_s17  ;;  %vm1203_vm11 = vcmp.eq.s32.totalorder %v221_v19, 1  ;;  %v287_v32 = vsel %vm285_vm7, 1, %v981_v9  ;;  %vm1208_vm12 = vcmp.eq.s32.totalorder %v327_v20, 1  ;;  %vm240_vm13 = vcmask 1043592   ;;  %s895_s28 = scalar_lea.vmem %s1309_s25, 256  ;;  %s982_s16 = smov [#allocation9]  }
  0x76   : > { %vm243_vm14 = vcmask 134144   ;;  %vm361_vm15 = vcmp.gt.f32.partialorder %v360_v23, 0.5  ;;  %vm431_vm0 = vcmp.gt.f32.partialorder %v430_v28, 0.5  ;;  %vm266_vm1 = vcmask 130048   ;;  %p896_p2 = scmp.ne.s32.totalorder %s1309_s25, %s895_s28  ;;  %s899_s20 = sshll.u32 %s982_s16, 4  ;;  %s900_s20 = int_to_ptr.vmem [resolvable:$false] %s899_s20 }
  0x77   : > { %v291_v38 = vrot.slane %v287_v32, %v1178_v8  ;;  %vm1224_vm2 = vcmp.eq.s32.totalorder %v257_v26, 1  ;;  %v295_v43 = vrot.slane %v287_v32, %v1184_v14  ;;  %v363_v44 = vsel %vm361_vm15, 1, %v981_v9  ;;  %v468_v61 = vld [vmem:[#allocation8 + $0x10] ss:$8 sm:$0x3]  ;;  %s901_s17 = scalar_lea.vmem %s900_s20, 512  ;;  %p902_p8 = scmp.lt.s32.totalorder %s1309_s25, %s900_s20 }
  0x78   : > { %302 = vrot.lane.b32.xlu1 %v331_v2, %s976_s23  ;;  %v433_v45 = vsel %vm431_vm0, 1, %v981_v9  ;;  %v371_v54 = vrot.slane %v363_v44, %v1184_v14  ;;  %vm310_vm7 = vcmask 1043576   ;;  %v367_v3 = vrot.slane %v363_v44, %v1178_v8  ;;  %p897_p1 = pnand %p896_p2, %p1116_p4  ;;  %p903_p12 = scmp.lt.s32.totalorder %s901_s17, %s895_s28 }
  0x79   : > { %300 = vrot.lane.b32.xlu0 %v318_v1, %s976_s23  ;;  %v441_v55 = vrot.slane %v433_v45, %v1184_v14  ;;  %v437_v4 = vrot.slane %v433_v45, %v1178_v8  ;;  %vm463_vm15 = vcmask 916484   ;;  %vm465_vm0 = vcmask 1048452  }
  0x7a   : > { %p898_p6 = pneg %p897_p1  ;;  %p904_p3 = por %p903_p12, %p902_p8 }
  0x7c   : > { %448 = vrot.lane.b32.xlu1 %v331_v2, %s978_s22  ;;  %p905_p7 = pnand %p904_p3, %p898_p6 }
  0x7d   : > { %378 = vrot.lane.b32.xlu0 %v331_v2, %s977_s26 }
  0x80   : > { %446 = vrot.lane.b32.xlu1 %v318_v1, %s978_s22 }
  0x81   : > { %376 = vrot.lane.b32.xlu0 %v318_v1, %s977_s26 }
  0x84   : > { %414 = vrot.lane.b32.xlu1 %v318_v1, %s979_s29 }
  0x85   : > { %416 = vrot.lane.b32.xlu0 %v331_v2, %s979_s29 }
  0x88   : > { %484 = vrot.lane.b32.xlu1 %v318_v1, %s980_s30 }
  0x89   : > { %486 = vrot.lane.b32.xlu0 %v331_v2, %s980_s30 }
  0xde   : > { %v333_v21 = vpop.permute.xlu1 %332 }
  0xdf   : > { %v263_v22 = vpop.permute.xlu0 %262  ;;  %v340_v24 = vsel %vm1187_vm3, %v333_v21, 0.0  ;;  %vm234_vm3 = vcmask 138240  }
  0xe0   : > { %v270_v25 = vsel %vm1191_vm4, %v263_v22, 0.0  ;;  %v344_v29 = vrot.slane %v340_v24, 4  ;;  %vm1228_vm4 = vcmp.eq.s32.totalorder %v225_v27, 1 }
  0xe1   : > { %v274_v30 = vrot.slane %v270_v25, 4 }
  0xe2   : > { %349 = vst.msk [vmem:[#allocation2 + $0x10] sm:$0xf0] %vm348_vm5, %v344_v29  ;;  %v335_v34 = vpop.permute.xlu1 %334  ;;  %vm1240_vm5 = vcmp.eq.s32.totalorder %v291_v38, 1 }
  0xe3   : > { %279 = vst.msk [vmem:[#allocation2] sm:$0xf0] %vm278_vm8, %v274_v30  ;;  %v231_v35 = vpop.permute.xlu0 %230  ;;  %v337_v36 = vsel %vm336_vm10, %v333_v21, %v335_v34  ;;  %vm297_vm8 = vcmp.eq.s32.totalorder %v295_v43, 1  ;;  %vm313_vm10 = vcmask 117760  }
  0xe4   : > { %352 = vst.msk [vmem:[#allocation2 + $0x10] sm:$0xf0] %vm351_vm6, %v972_v0  ;;  %v238_v37 = vsel %vm1203_vm11, %v231_v35, 0.0  ;;  %v341_v39 = vsel %vm1208_vm12, %v337_v36, 0.0  ;;  %vm304_vm6 = vcmask 121856   ;;  %vm1252_vm11 = vcmp.eq.s32.totalorder %v371_v54, 1 }
  0xe5   : > { %282 = vst.msk [vmem:[#allocation2] sm:$0xf0] %vm281_vm9, %v972_v0  ;;  %v345_v42 = vrot.slane %v341_v39, 4  ;;  %vm399_vm9 = vcmp.gt.f32.partialorder %v398_v48, 0.5  ;;  %vm1256_vm12 = vcmp.eq.s32.totalorder %v441_v55, 1 }
  0xe6   : > { %241 = vst.msk [vmem:[#allocation2] sm:$0xf] %vm240_vm13, %v238_v37  ;;  %v233_v47 = vpop.permute.xlu1 %232  ;;  %v401_v2 = vsel %vm399_vm9, 1, %v981_v9  ;;  %vm393_vm13 = vcmask 1039364  }
  0xe7   : > { %244 = vst.msk [vmem:[#allocation2] sm:$0xf] %vm243_vm14, %v972_v0  ;;  %v265_v46 = vpop.permute.xlu0 %264  ;;  %350 = vst [vmem:[#allocation2 + $0x18] sm:$0xf0] %v345_v42  ;;  %v235_v50 = vsel %vm234_vm3, %v231_v35, %v233_v47  ;;  %vm395_vm14 = vcmask 1048572   ;;  %v409_v11 = vrot.slane %v401_v2, %v1184_v14  ;;  %v405_v12 = vrot.slane %v401_v2, %v1178_v8 }
  0xe8   : > { %v267_v49 = vsel %vm266_vm1, %v263_v22, %v265_v46  ;;  %v239_v53 = vsel %vm1228_vm4, %v235_v50, 0.0  ;;  %vm469_vm1 = vcmp.gt.f32.partialorder %v468_v61, 0.5  ;;  %vm450_vm3 = vcmask 916480  }
  0xe9   : > { %v271_v52 = vsel %vm1224_vm2, %v267_v49, 0.0  ;;  %242 = vst [vmem:[#allocation2 + $0x8] sm:$0xf] %v239_v53  ;;  %vm380_vm2 = vcmask 1039360   ;;  %vm1270_vm4 = vcmp.eq.s32.totalorder %v367_v3, 1  ;;  %v471_v18 = vsel %vm469_vm1, 1, %v981_v9 }
  0xea   : > { %v275_v56 = vrot.slane %v271_v52, 4  ;;  %v303_v58 = vpop.permute.xlu1 %302  ;;  %vm1289_vm9 = vcmp.eq.s32.totalorder %v405_v12, 1  ;;  %v475_v29 = vrot.slane %v471_v18, %v1178_v8  ;;  %v479_v30 = vrot.slane %v471_v18, %v1184_v14  ;;  %v499_v52 = vld [vmem:[#allocation6] sm:$0xff] }
  0xeb   : > { %v301_v57 = vpop.permute.xlu0 %300  ;;  %vm510_vm1 = vcmask 293888  }
  0xec   : > { %280 = vst [vmem:[#allocation2 + $0x8] sm:$0xf0] %v275_v56  ;;  %v308_v59 = vsel %vm1240_vm5, %v301_v57, 0.0  ;;  %v305_v60 = vsel %vm304_vm6, %v301_v57, %v303_v58  ;;  %vm1274_vm5 = vcmp.eq.s32.totalorder %v437_v4, 1  ;;  %vm425_vm6 = vcmask 920576  }
  0xed   : > { %311 = vst.msk [vmem:[#allocation2 + $0x10] sm:$0xf] %vm310_vm7, %v308_v59  ;;  %v309_v62 = vsel %vm297_vm8, %v305_v60, 0.0  ;;  %vm418_vm7 = vcmask 924672   ;;  %vm1285_vm8 = vcmp.eq.s32.totalorder %v409_v11, 1 }
  0xee   : > { %314 = vst.msk [vmem:[#allocation2 + $0x10] sm:$0xf] %vm313_vm10, %v972_v0  ;;  %312 = vst [vmem:[#allocation2 + $0x18] sm:$0xf] %v309_v62  ;;  %v449_v6 = vpop.permute.xlu1 %448  ;;  %v500_v21 = vld [vmem:[#allocation2] sm:$0xff]  ;;  %vm427_vm10 = vcmask 1044360  }
  0xef   : > { %v379_v5 = vpop.permute.xlu0 %378  ;;  %v455_v10 = vsel %vm1256_vm12, %v449_v6, 0.0  ;;  %vm488_vm12 = vcmask 908288  }
  0xf0   : > { %v385_v7 = vsel %vm1252_vm11, %v379_v5, 0.0  ;;  %v459_v15 = vrot.slane %v455_v10, 4  ;;  %vm481_vm11 = vcmp.eq.s32.totalorder %v479_v30, 1 }
  0xf1   : > { %v389_v13 = vrot.slane %v385_v7, 4 }
  0xf2   : > { %464 = vst.msk [vmem:[#allocation2 + $0x38] sm:$0xf0] %vm463_vm15, %v459_v15  ;;  %v447_v20 = vpop.permute.xlu1 %446  ;;  %vm497_vm15 = vcmask 1044344  }
  0xf3   : > { %394 = vst.msk [vmem:[#allocation2 + $0x28] sm:$0xf0] %vm393_vm13, %v389_v13  ;;  %v377_v19 = vpop.permute.xlu0 %376  ;;  %v451_v23 = vsel %vm450_vm3, %v447_v20, %v449_v6  ;;  %v501_v27 = vld [vmem:[#allocation2 + $0x8] sm:$0xff]  ;;  %vm495_vm13 = vcmask 904192  }
  0xf4   : > { %396 = vst.msk [vmem:[#allocation2 + $0x28] sm:$0xf0] %vm395_vm14, %v972_v0  ;;  %v381_v22 = vsel %vm380_vm2, %v377_v19, %v379_v5  ;;  %v454_v26 = vsel %vm1274_vm5, %v451_v23, 0.0  ;;  %vm480_vm14 = vcmp.eq.s32.totalorder %v475_v29, 1 }
  0xf5   : > { %466 = vst.msk [vmem:[#allocation2 + $0x38] sm:$0xf0] %vm465_vm0, %v972_v0  ;;  %v384_v25 = vsel %vm1270_vm4, %v381_v22, 0.0  ;;  %v503_v28 = vld [vmem:[#allocation2 + $0x18] sm:$0xff]  ;;  %v502_v31 = vld [vmem:[#allocation2 + $0x10] sm:$0xff]  ;;  %v458_v33 = vrot.slane %v454_v26, 4 }
  0xf6   : > { %v388_v32 = vrot.slane %v384_v25, 4  ;;  %v721_v34 = vpack.c.bf16 %v503_v28, %v501_v27  ;;  %v723_v35 = vpack.c.bf16 %v502_v31, %v500_v21  ;;  %v415_v37 = vpop.permute.xlu1 %414  ;;  %vm514_vm0 = vcmask 1043456  }
  0xf7   : > { %v417_v36 = vpop.permute.xlu0 %416  ;;  %462 = vst [vmem:[#allocation2 + $0x30] sm:$0xf0] %v458_v33 }
  0xf8   : > { %392 = vst [vmem:[#allocation2 + $0x20] sm:$0xf0] %v388_v32  ;;  %v423_v38 = vsel %vm1285_vm8, %v417_v36, 0.0  ;;  %v419_v39 = vsel %vm418_vm7, %v415_v37, %v417_v36  ;;  %722 = vmatprep.subr.bf16.mxu0 %v721_v34 }
  0xf9   : > { %426 = vst.msk [vmem:[#allocation2 + $0x38] sm:$0xf] %vm425_vm6, %v423_v38  ;;  %v422_v8 = vsel %vm1289_vm9, %v419_v39, 0.0  ;;  %724 = vmatpush1.bf16.msra.mxu0 %v723_v35 }
  0xfa   : > { %428 = vst.msk [vmem:[#allocation2 + $0x38] sm:$0xf] %vm427_vm10, %v972_v0  ;;  %424 = vst [vmem:[#allocation2 + $0x30] sm:$0xf] %v422_v8  ;;  %v485_v40 = vpop.permute.xlu1 %484 }
  0xfb   : > { %v487_v14 = vpop.permute.xlu0 %486  ;;  %v505_v44 = vld [vmem:[#allocation2 + $0x28] sm:$0xff] }
  0xfc   : > { %v493_v41 = vsel %vm481_vm11, %v487_v14, 0.0  ;;  %v489_v42 = vsel %vm488_vm12, %v485_v40, %v487_v14 }
  0xfd   : > { %496 = vst.msk [vmem:[#allocation2 + $0x48] sm:$0xf] %vm495_vm13, %v493_v41  ;;  %v492_v43 = vsel %vm480_vm14, %v489_v42, 0.0 }
  0xfe   : > { %498 = vst.msk [vmem:[#allocation2 + $0x48] sm:$0xf] %vm497_vm15, %v972_v0  ;;  %494 = vst [vmem:[#allocation2 + $0x40] sm:$0xf] %v492_v43 }
  0xff   : > { %v504_v46 = vld [vmem:[#allocation2 + $0x20] sm:$0xff] }
 0x101   : > { %v507_v45 = vld [vmem:[#allocation2 + $0x38] sm:$0xff]  ;;  %v506_v47 = vld [vmem:[#allocation2 + $0x30] sm:$0xff] }
 0x102   : > { %v725_v48 = vpack.c.bf16 %v507_v45, %v505_v44  ;;  %v727_v49 = vpack.c.bf16 %v506_v47, %v504_v46 }
 0x104   : > { %726 = vmatprep.subr.bf16.mxu0 %v725_v48 }
 0x105   : > { %728 = vmatpush1.bf16.msra.mxu0 %v727_v49  ;;  %v509_v50 = vld [vmem:[#allocation2 + $0x48] sm:$0xf]  ;;  %v508_v51 = vld [vmem:[#allocation2 + $0x40] sm:$0xf] }
 0x106   : > { %711 = vmatprep.subr.msk.mxu0 %vm514_vm0, %v509_v50 }
 0x109   : > { %712 = vmatpush1.msk.msra.mxu0 %vm514_vm0, %v508_v51 }
 0x10a   : > { %713 = vmatmul.mubr.msk.f32.vlgmr.msra.gmra.mrb[0].mxu0 %vm510_vm1, %v499_v52 }
 0x1dd   : > { %v587_v0 = vpop.f32.mrb[0].mxu0 }
 0x1de   : > { %592 = vst [vmem:[%s213_s6] sm:$0xff] %v587_v0  ;;  %v589_v53 = vpop.f32.mrb[1].mxu0 }
 0x1df   : > { %593 = vst [vmem:[%s213_s6 + $0x8] sm:$0xff] %v589_v53 }
 0x1e0   : > { %908 = shalt.err (!%p905_p7)
}
 0x1e1   : > { %s909_s11 = scalar_lea.hbm %s1314_s21, 256  ;;  %s913_s26 = scalar_lea.hbm %s1359_s3, 512 }
 0x1e2   : > { %p910_p10 = scmp.ne.s32.totalorder %s1314_s21, %s909_s11  ;;  %p914_p0 = scmp.lt.u32.totalorder %s1314_s21, %s1359_s3 }
 0x1e3   : > { %p915_p9 = scmp.lt.u32.totalorder %s913_s26, %s909_s11  ;;  %p917_p2 = scmp.lt.u32.totalorder %s909_s11, %s1314_s21 }
 0x1e4   : > { %p911_p13 = pnand %p910_p10, %p1116_p4 }
 0x1e5   : > { %p916_p11 = por %p915_p9, %p914_p0 }
 0x1e6   : > { %p912_p5 = pneg %p911_p13 }
 0x1e7   : > { %p918_p1 = por %p917_p2, %p916_p11 }
 0x1e9   : > { %p919_p6 = pnand %p918_p1, %p912_p5 }
 0x1eb   : > { %922 = shalt.err (!%p919_p6)
}
 0x1ec   : > { %739 = dma.vmem_to_hbm [thread:$0]  (%p1116_p4), %s1309_s25, 256, %s1314_s21, %s595_s27  }
 0x1ed PF: > { %s621_s30 = sand.u32 1, %s953_s12   ;;  %p1400_p8 = scmp.ne.s32.totalorder %s1364_s19, 0 }
 0x1ee   : > { %p1401_p12 = scmp.ge.s32.totalorder %s965_s15, 2  ;;  %s622_s5 = scalar_lea.sflag [#allocation5], %s621_s30 }
 0x1f0   : > { %p753_p3 = pnand %p1401_p12, %p1400_p8 }
 0x1f2   : > { %948 = dma.done.wait (!%p753_p3), %s622_s5, 256  }
 0x1f3   : > { %950 = vsyncadd (!%p753_p3), %s622_s5, 4294967040  ;;  %p17_p7 = scmp.ge.s32.totalorder %s1106_s4, 4   ;;  %s1402_s12 = smov %s957_s13 }
 0x1f4   : > { %s1403_s13 = smov %s961_s14  ;;  %s1404_s14 = smov %s1122_s8 }
 0x1f5   : > { %s1405_s15 = smov %s1106_s4  ;;  %19 = sbr.rel (!%p17_p7) target bundleno = 6 (0x6), region = 92 }
 0x1fc   :  { %627 = vsyncpa [#allocation4], 1 }
 0x1fd   :  { %629 = vsyncpa [#allocation4 + $0x1], 1 }
 0x1fe   :  { %630 = vsyncpa [#allocation7], 1 }
 0x1ff   :  { %631 = vsyncpa [#allocation5], 1 }
 0x200   :  { %633 = vsyncpa [#allocation5 + $0x1], 1 }

</bundles_post_ra>
